<compile_context>
chip_gen: v7x
topology: tpu7x:2x2x1
jax: 0.10.0
libtpu: 0.0.40
codegen_flags: <defaults>
</compile_context>

<pallas_src>
import functools

import numpy as np
import jax
import jax.numpy as jnp
from jax.experimental import pallas as pl
from jax.experimental.pallas import tpu as pltpu

LANE = 128
_VMEM_LIMIT = None  # lazily derived, generation-aware


def _round_up(x, m):
    return ((x + m - 1) // m) * m


def _pad2d(a, rows, cols):
    return jnp.pad(a, ((0, rows - a.shape[0]), (0, cols - a.shape[1])))


def _block_diag(mats):
    rows = sum(int(m.shape[0]) for m in mats)
    cols = sum(int(m.shape[1]) for m in mats)
    out = jnp.zeros((rows, cols), mats[0].dtype)
    r = c = 0
    for m in mats:
        out = out.at[r:r + m.shape[0], c:c + m.shape[1]].set(m)
        r += int(m.shape[0])
        c += int(m.shape[1])
    return out


def _pick_tile(n, cap):
    """Largest multiple-of-128 divisor of n that is <= cap (n multiple of 128)."""
    cap = max(LANE, min(int(cap), n))
    best = LANE
    for t in range(LANE, cap + 1, LANE):
        if n % t == 0:
            best = t
    return best


def _vmem_limit_bytes():
    """Generation-aware scoped-VMEM limit (v7x: 64 MiB physical -> 48 MiB;
    v5e/v6e: 128 MiB physical -> 96 MiB; unknown -> conservative 48 MiB)."""
    global _VMEM_LIMIT
    if _VMEM_LIMIT is None:
        phys = 0
        try:
            info = pltpu.get_tpu_info()
            phys = int(getattr(info, "vmem_capacity_bytes", 0) or 0)
        except Exception:
            phys = 0
        if phys and phys > 64 * 1024 * 1024:
            _VMEM_LIMIT = 96 * 1024 * 1024
        else:
            _VMEM_LIMIT = 48 * 1024 * 1024
    return _VMEM_LIMIT


# ----------------------------------------------------------------------------
# Pallas kernels
# ----------------------------------------------------------------------------
def _fused_small_kernel(x_ref, adj_ref, w1_ref, b1_ref, w2_ref, b2_ref,
                        wft_ref, bf_ref, out_ref):
    """Small-graph path: both GCN layers + fusion Linear, all resident in VMEM."""
    adj = adj_ref[...]                                               # bf16
    s1 = jnp.dot(x_ref[...], w1_ref[...],
                 preferred_element_type=jnp.float32)
    h1 = jnp.maximum(
        jnp.dot(adj, s1.astype(adj.dtype),
                preferred_element_type=jnp.float32) + b1_ref[...], 0.0)
    # TODO(synk): training-mode dropout (pltpu.prng_*) not implemented;
    # F.dropout is the identity in eval mode.
    s2 = jnp.dot(h1.astype(w2_ref.dtype), w2_ref[...],
                 preferred_element_type=jnp.float32)
    h2 = jnp.dot(adj, s2.astype(adj.dtype),
                 preferred_element_type=jnp.float32) + b2_ref[...]
    out = jnp.dot(h2.astype(wft_ref.dtype), wft_ref[...],
                  preferred_element_type=jnp.float32)
    out_ref[...] = (out + bf_ref[...]).astype(out_ref.dtype)


def _support_kernel(x_ref, w_ref, s_ref):
    # S1 = X_cat @ blockdiag(W1) : bf16 x bf16 -> f32 accumulate on the MXU.
    s = jnp.dot(x_ref[...], w_ref[...], preferred_element_type=jnp.float32)
    s_ref[...] = s.astype(s_ref.dtype)


def _layer1_kernel(adj_ref, s1_ref, b1_ref, w2_ref, s2_ref, acc_ref,
                   *, tk, s_resident):
    # acc(i) = sum_k adj[i,k] @ S1[k];  finalize: S2[i] = relu(acc + b1) @ W2_bd
    k = pl.program_id(1)
    if s_resident:
        off = pl.multiple_of(k * tk, LANE)
        s_blk = s1_ref[pl.ds(off, tk), :]
    else:
        s_blk = s1_ref[...]
    partial = jnp.dot(adj_ref[...], s_blk, preferred_element_type=jnp.float32)

    @pl.when(k == 0)
    def _():
        acc_ref[...] = partial          # direct write: no zero-init + RMW

    @pl.when(k > 0)
    def _():
        acc_ref[...] += partial

    @pl.when(k == pl.num_programs(1) - 1)
    def _():
        h1 = jnp.maximum(acc_ref[...] + b1_ref[...], 0.0)
        # TODO(synk): training-mode dropout not implemented (eval identity).
        s2 = jnp.dot(h1.astype(w2_ref.dtype), w2_ref[...],
                     preferred_element_type=jnp.float32)
        s2_ref[...] = s2.astype(s2_ref.dtype)


def _layer2_fusion_kernel(adj_ref, s2_ref, b2_ref, wft_ref, bf_ref,
                          out_ref, acc_ref, *, tk, s_resident):
    # acc(i) = sum_k adj[i,k] @ S2[k]; finalize: out[i] = (acc + b2) @ W_f^T + b_f
    # (W_f is pre-transposed to (h_pad, o_pad) in the wrapper -> plain jnp.dot).
    k = pl.program_id(1)
    if s_resident:
        off = pl.multiple_of(k * tk, LANE)
        s_blk = s2_ref[pl.ds(off, tk), :]
    else:
        s_blk = s2_ref[...]
    partial = jnp.dot(adj_ref[...], s_blk, preferred_element_type=jnp.float32)

    @pl.when(k == 0)
    def _():
        acc_ref[...] = partial

    @pl.when(k > 0)
    def _():
        acc_ref[...] += partial

    @pl.when(k == pl.num_programs(1) - 1)
    def _():
        h2 = acc_ref[...] + b2_ref[...]
        out = jnp.dot(h2.astype(wft_ref.dtype), wft_ref[...],
                      preferred_element_type=jnp.float32)
        out_ref[...] = (out + bf_ref[...]).astype(out_ref.dtype)


# ----------------------------------------------------------------------------
# One-time preparation (hoisted out of the forward path per perf review)
# ----------------------------------------------------------------------------
def prepare_adjacency(adj_fused, n):
    """One-time pad + bf16 cast of the (static) SNF-fused adjacency."""
    n_pad = _round_up(max(int(n), 8), LANE)
    adj = jnp.asarray(adj_fused, jnp.float32)
    return _pad2d(adj, n_pad, n_pad).astype(jnp.bfloat16)


def prepare_parameters(params):
    """One-time block-diag fusion, padding and bf16 cast of all weights."""
    gcn = params["gcn"]
    w1_bd = _block_diag([p["w1"] for p in gcn])          # [d_tot, h_tot]
    w2_bd = _block_diag([p["w2"] for p in gcn])          # [h_tot, h_tot]
    b1 = jnp.concatenate([p["b1"] for p in gcn])
    b2 = jnp.concatenate([p["b2"] for p in gcn])
    d_tot, h_tot = int(w1_bd.shape[0]), int(w1_bd.shape[1])
    o_dim = int(params["fusion_w"].shape[0])
    d_pad = _round_up(d_tot, LANE)
    h_pad = _round_up(h_tot, LANE)
    o_pad = _round_up(o_dim, LANE)
    bf16 = jnp.bfloat16
    return {
        "w1": _pad2d(w1_bd, d_pad, h_pad).astype(bf16),
        "w2": _pad2d(w2_bd, h_pad, h_pad).astype(bf16),
        # fusion weight pre-transposed -> (h_pad, o_pad): finalize is jnp.dot.
        "wft": _pad2d(params["fusion_w"].T, h_pad, o_pad).astype(bf16),
        "b1": jnp.pad(b1, (0, h_pad - h_tot)).reshape(1, h_pad),   # f32
        "b2": jnp.pad(b2, (0, h_pad - h_tot)).reshape(1, h_pad),   # f32
        "bf": jnp.pad(params["fusion_b"], (0, o_pad - o_dim)).reshape(1, o_pad),
    }


# ----------------------------------------------------------------------------
# Forward pass (jit this; adj_p / prep come from the prepare_* helpers)
# ----------------------------------------------------------------------------
def cross_omics_gcn_forward(prep, x_list, adj_p, *, n, output_dim,
                            force_streaming=False, tm_cap=512, tk_cap=2048):
    n_pad = adj_p.shape[0]
    d_pad, h_pad = prep["w1"].shape
    o_pad = prep["wft"].shape[1]
    bf16 = jnp.bfloat16

    # Zero padding keeps the math exact: padded feature columns hit zero
    # weight rows; padded node ROWS of S2 contain relu(b1)@W2 garbage, but
    # adj's padded COLUMNS are zero, so that garbage never reaches valid rows.
    x_cat = jnp.concatenate(list(x_list), axis=1)
    x_p = _pad2d(x_cat, n_pad, d_pad).astype(bf16)

    vmem_limit = _vmem_limit_bytes()
    budget = int(vmem_limit * 0.75)

    def cparams(sem):
        return pltpu.CompilerParams(dimension_semantics=sem,
                                    vmem_limit_bytes=vmem_limit)

    # ---- small-graph path: one fused kernel, everything resident in VMEM ----
    small_bytes = 2 * (n_pad * n_pad + n_pad * d_pad + d_pad * h_pad
                       + h_pad * h_pad + h_pad * o_pad)
    small_bytes += 4 * (3 * n_pad * h_pad + n_pad * o_pad)   # f32 intermediates
    if (not force_streaming) and small_bytes <= budget // 2:
        out = pl.pallas_call(
            _fused_small_kernel,
            out_shape=jax.ShapeDtypeStruct((n_pad, o_pad), jnp.float32),
            grid=(1,),
            in_specs=[
                pl.BlockSpec((n_pad, d_pad), lambda i: (0, 0)),
                pl.BlockSpec((n_pad, n_pad), lambda i: (0, 0)),
                pl.BlockSpec((d_pad, h_pad), lambda i: (0, 0)),
                pl.BlockSpec((1, h_pad), lambda i: (0, 0)),
                pl.BlockSpec((h_pad, h_pad), lambda i: (0, 0)),
                pl.BlockSpec((1, h_pad), lambda i: (0, 0)),
                pl.BlockSpec((h_pad, o_pad), lambda i: (0, 0)),
                pl.BlockSpec((1, o_pad), lambda i: (0, 0)),
            ],
            out_specs=pl.BlockSpec((n_pad, o_pad), lambda i: (0, 0)),
            compiler_params=cparams(("arbitrary",)),
        )(x_p, adj_p, prep["w1"], prep["b1"], prep["w2"], prep["b2"],
          prep["wft"], prep["bf"])
        return out[:n, :output_dim]

    # ---- streaming path: adj streamed twice (mathematical minimum) ----------
    # Tile selection: big tiles (HBM-bound passes), but keep n_i >= 2 so both
    # v7x TensorCores get row blocks when n_pad allows.
    tm_lim = min(tm_cap, n_pad // 2) if n_pad >= 2 * LANE else n_pad
    tm = _pick_tile(n_pad, tm_lim)
    tk = _pick_tile(n_pad, tk_cap)

    def pass_bytes(tm_, tk_, resident):
        s_bytes = (n_pad * h_pad * 2) if resident else (2 * tk_ * h_pad * 2)
        return (3 * tm_ * tk_ * 2                      # adj tiles (Buffered<=3)
                + tm_ * h_pad * 4                      # f32 accumulator
                + 2 * tm_ * max(h_pad, o_pad) * 4      # output blocks
                + 2 * (h_pad * h_pad + h_pad * o_pad)  # resident weights
                + s_bytes)

    s_resident = pass_bytes(tm, tk, True) <= budget
    while pass_bytes(tm, tk, s_resident) > budget and tk > LANE:
        tk = _pick_tile(n_pad, tk - LANE)
    while pass_bytes(tm, tk, s_resident) > budget and tm > LANE:
        tm = _pick_tile(n_pad, tm - LANE)

    n_i, n_k = n_pad // tm, n_pad // tk
    nbuf = 3 if n_k >= 3 else 2
    s_stream = n_pad * h_pad * 2 * (1 if s_resident else n_i)

    # (1) S1 = X_cat @ W1_bd  -- row-tiled, weights resident, tiny.
    s1 = pl.pallas_call(
        _support_kernel,
        out_shape=jax.ShapeDtypeStruct((n_pad, h_pad), bf16),
        grid=(n_i,),
        in_specs=[pl.BlockSpec((tm, d_pad), lambda i: (i, 0)),
                  pl.BlockSpec((d_pad, h_pad), lambda i: (0, 0))],
        out_specs=pl.BlockSpec((tm, h_pad), lambda i: (i, 0)),
        compiler_params=cparams(("parallel",)),
        cost_estimate=pl.CostEstimate(
            flops=2 * n_pad * d_pad * h_pad,
            transcendentals=0,
            bytes_accessed=2 * (n_pad * d_pad + d_pad * h_pad + n_pad * h_pad)),
    )(x_p, prep["w1"])

    adj_spec = pl.BlockSpec((tm, tk), lambda i, k: (i, k),
                            pipeline_mode=pl.Buffered(nbuf))
    if s_resident:
        # Resident S: fetched once, k-chunk sliced in-kernel -> near-pure
        # adj streaming per pass.
        s_spec = pl.BlockSpec((n_pad, h_pad), lambda i, k: (0, 0))
    else:
        s_spec = pl.BlockSpec((tk, h_pad), lambda i, k: (k, 0))
    bias_h_spec = pl.BlockSpec((1, h_pad), lambda i, k: (0, 0))

    # (2) S2 = relu(adj @ S1 + b1) @ W2_bd  -- first adj pass.
    layer1 = functools.partial(_layer1_kernel, tk=tk, s_resident=s_resident)
    s2 = pl.pallas_call(
        layer1,
        out_shape=jax.ShapeDtypeStruct((n_pad, h_pad), bf16),
        grid=(n_i, n_k),                                 # reduction axis last
        in_specs=[adj_spec, s_spec, bias_h_spec,
                  pl.BlockSpec((h_pad, h_pad), lambda i, k: (0, 0))],
        out_specs=pl.BlockSpec((tm, h_pad), lambda i, k: (i, 0)),
        scratch_shapes=[pltpu.VMEM((tm, h_pad), jnp.float32)],
        compiler_params=cparams(("parallel", "arbitrary")),
        cost_estimate=pl.CostEstimate(
            flops=2 * n_pad * n_pad * h_pad + 2 * n_pad * h_pad * h_pad,
            transcendentals=0,
            bytes_accessed=(2 * n_pad * n_pad + s_stream
                            + 2 * h_pad * h_pad + 2 * n_pad * h_pad)),
    )(adj_p, s1, prep["b1"], prep["w2"])

    # (3) out = (adj @ S2 + b2) @ W_f^T + b_f  -- second adj pass + fusion.
    layer2 = functools.partial(_layer2_fusion_kernel, tk=tk,
                               s_resident=s_resident)
    out = pl.pallas_call(
        layer2,
        out_shape=jax.ShapeDtypeStruct((n_pad, o_pad), jnp.float32),
        grid=(n_i, n_k),
        in_specs=[adj_spec, s_spec, bias_h_spec,
                  pl.BlockSpec((h_pad, o_pad), lambda i, k: (0, 0)),
                  pl.BlockSpec((1, o_pad), lambda i, k: (0, 0))],
        out_specs=pl.BlockSpec((tm, o_pad), lambda i, k: (i, 0)),
        scratch_shapes=[pltpu.VMEM((tm, h_pad), jnp.float32)],
        compiler_params=cparams(("parallel", "arbitrary")),
        cost_estimate=pl.CostEstimate(
            flops=2 * n_pad * n_pad * h_pad + 2 * n_pad * h_pad * o_pad,
            transcendentals=0,
            bytes_accessed=(2 * n_pad * n_pad + s_stream
                            + 2 * h_pad * o_pad + 4 * n_pad * o_pad)),
    )(adj_p, s2, prep["b2"], prep["wft"], prep["bf"])

    return out[:n, :output_dim]


# ----------------------------------------------------------------------------
# SNF (host-side numpy preprocessing, mirroring the torch module)
# ----------------------------------------------------------------------------
class SimilarityNetworkFusion:
    def __init__(self, K=20, t=20):
        self.K = K
        self.t = t

    def _compute_similarity(self, data):
        diff = data[:, None, :] - data[None, :, :]
        dist = np.sqrt(np.sum(diff * diff, axis=-1))
        sigma = np.mean(dist) * 0.5
        return np.exp(-dist ** 2 / (2 * sigma ** 2))

    def _normalize_adjacency(self, W):
        D = np.sum(W, axis=1)
        # epsilon guard: isolated nodes would otherwise produce inf/NaN
        D = np.diag(1.0 / np.sqrt(D + 1e-12))
        return D @ W @ D

    def _compute_affinity_matrix(self, W):
        n = W.shape[0]
        W_knn = np.zeros_like(W)
        for i in range(n):
            idx = np.argsort(W[i, :])[-self.K:]
            W_knn[i, idx] = W[i, idx]
        return (W_knn + W_knn.T) / 2

    def fuse(self, data_list):
        W_list = []
        for data in data_list:
            W = self._compute_similarity(np.asarray(data, dtype=np.float64))
            W = self._normalize_adjacency(W)
            W = self._compute_affinity_matrix(W)
            W_list.append(W)
        W_fused = np.mean(W_list, axis=0)
        for _ in range(self.t):
            W_new = np.zeros_like(W_fused)
            for W in W_list:
                W_new += W @ W_fused @ W.T
            W_fused = W_new / len(W_list)
            W_fused = self._normalize_adjacency(W_fused)
        return W_fused.astype(np.float32)


# ----------------------------------------------------------------------------
# Parameter init (mirrors the torch module defaults) and f32 reference
# ----------------------------------------------------------------------------
def xavier_uniform(key, shape):
    fan_in, fan_out = shape
    bound = np.sqrt(6.0 / (fan_in + fan_out))
    return jax.random.uniform(key, shape, jnp.float32, -bound, bound)


def init_params(key, input_dims, hidden_dim, output_dim):
    params = {"gcn": []}
    for dim in input_dims:
        key, k1, k2 = jax.random.split(key, 3)
        params["gcn"].append({
            "w1": xavier_uniform(k1, (dim, hidden_dim)),
            "b1": jnp.zeros((hidden_dim,), jnp.float32),
            "w2": xavier_uniform(k2, (hidden_dim, hidden_dim)),
            "b2": jnp.zeros((hidden_dim,), jnp.float32),
        })
    key, kw, kb = jax.random.split(key, 3)
    fan_in = hidden_dim * len(input_dims)
    bound = 1.0 / np.sqrt(fan_in)
    params["fusion_w"] = jax.random.uniform(
        kw, (output_dim, fan_in), jnp.float32, -bound, bound)
    params["fusion_b"] = jax.random.uniform(
        kb, (output_dim,), jnp.float32, -bound, bound)
    return params


def reference_forward(params, x_list, adj):
    """Pure-JAX f32 reference (same math as the torch module in eval mode)."""
    hs = []
    for x, p in zip(x_list, params["gcn"]):
        h1 = jax.nn.relu(adj @ (x @ p["w1"]) + p["b1"])
        h2 = adj @ (h1 @ p["w2"]) + p["b2"]
        hs.append(h2)
    return (jnp.concatenate(hs, axis=1) @ params["fusion_w"].T
            + params["fusion_b"])


def _check(out, ref, rel=5e-2, abs_tol=1e-2):
    assert bool(jnp.all(jnp.isfinite(out)))
    err = float(jnp.max(jnp.abs(out - ref)))
    scale = float(jnp.max(jnp.abs(ref))) + 1e-6
    # Tightened vs the old 10% bound; bf16 adj/weights, f32 accumulation.
    assert err <= rel * scale + abs_tol, (err, scale)


# ----------------------------------------------------------------------------
if __name__ == "__main__":
    N = 8                      # number of samples / graph nodes
    input_dims = (16, 12)      # two omics modalities
    hidden_dim = 32
    output_dim = 8

    key = jax.random.PRNGKey(0)
    key, *xkeys = jax.random.split(key, 1 + len(input_dims))
    x_list = [jax.random.normal(k, (N, d), jnp.float32)
              for k, d in zip(xkeys, input_dims)]
    key, *akeys = jax.random.split(key, 1 + len(input_dims))
    # adj_list in the torch module is a list of raw data matrices fed to SNF
    adj_data = [np.asarray(jax.random.normal(k, (N, d), jnp.float32))
                for k, d in zip(akeys, (10, 6))]

    adj_fused = SimilarityNetworkFusion().fuse(adj_data)     # host-side numpy

    params = init_params(jax.random.PRNGKey(0), input_dims, hidden_dim,
                         output_dim)
    prep = prepare_parameters(params)                         # one-time
    adj_p = prepare_adjacency(adj_fused, N)                   # one-time

    forward = jax.jit(
        cross_omics_gcn_forward,
        static_argnames=("n", "output_dim", "force_streaming",
                         "tm_cap", "tk_cap"))

    # ---- Test A: small graph -> single fused VMEM-resident kernel path ----
    out = forward(prep, x_list, adj_p, n=N, output_dim=output_dim)
    out = jax.block_until_ready(out)
    assert out.shape == (N, output_dim), out.shape
    ref = reference_forward(params, x_list, jnp.asarray(adj_fused, jnp.float32))
    _check(out, ref)

    # ---- Test B: larger synthetic graph, forced 3-kernel streaming path ----
    # Small tile caps so the k-reduction runs multiple steps and exercises the
    # resident-S slicing, Buffered(3) adj pipeline and pl.when accumulate/
    # finalize logic. Synthetic normalized adjacency (SNF skipped; static).
    Nb = 300
    kb = jax.random.PRNGKey(0)
    kb, kw, kb1, kb2 = jax.random.split(kb, 4)
    W = jnp.abs(jax.random.normal(kw, (Nb, Nb), jnp.float32)) + 1e-3
    W = (W + W.T) / 2
    deg = jnp.sum(W, axis=1)
    adj_b = W / (jnp.sqrt(deg)[:, None] * jnp.sqrt(deg)[None, :])
    xb_list = [jax.random.normal(k, (Nb, d), jnp.float32)
               for k, d in zip((kb1, kb2), input_dims)]
    adj_bp = prepare_adjacency(adj_b, Nb)
    out_b = forward(prep, xb_list, adj_bp, n=Nb, output_dim=output_dim,
                    force_streaming=True, tm_cap=128, tk_cap=128)
    out_b = jax.block_until_ready(out_b)
    assert out_b.shape == (Nb, output_dim), out_b.shape
    ref_b = reference_forward(params, xb_list, adj_b)
    _check(out_b, ref_b)

    print("KERNEL_OK")
</pallas_src>

<mosaic_0001>
module attributes {stable_mosaic.version = 11 : i64} {
  func.func @_fused_small_kernel(%arg0: i32, %arg1: memref<128x128xbf16, #tpu.memory_space<vmem>>, %arg2: memref<128x128xbf16, #tpu.memory_space<vmem>>, %arg3: memref<128x128xbf16, #tpu.memory_space<vmem>>, %arg4: memref<1x128xf32, #tpu.memory_space<vmem>>, %arg5: memref<128x128xbf16, #tpu.memory_space<vmem>>, %arg6: memref<1x128xf32, #tpu.memory_space<vmem>>, %arg7: memref<128x128xbf16, #tpu.memory_space<vmem>>, %arg8: memref<1x128xf32, #tpu.memory_space<vmem>>, %arg9: memref<128x128xf32, #tpu.memory_space<vmem>>) attributes {dimension_semantics = [#tpu.dimension_semantics<arbitrary>], iteration_bounds = array<i64: 1>, scalar_prefetch = 0 : i64, scratch_operands = 0 : i64, tpu.core_type = #tpu.core_type<tc>, window_params = [{pipeline_mode = #tpu.pipeline_mode<synchronous>, transform_indices = @transform_0, window_bounds = array<i64: 128, 128>}, {pipeline_mode = #tpu.pipeline_mode<synchronous>, transform_indices = @transform_1, window_bounds = array<i64: 128, 128>}, {pipeline_mode = #tpu.pipeline_mode<synchronous>, transform_indices = @transform_2, window_bounds = array<i64: 128, 128>}, {pipeline_mode = #tpu.pipeline_mode<synchronous>, transform_indices = @transform_3, window_bounds = array<i64: 1, 128>}, {pipeline_mode = #tpu.pipeline_mode<synchronous>, transform_indices = @transform_4, window_bounds = array<i64: 128, 128>}, {pipeline_mode = #tpu.pipeline_mode<synchronous>, transform_indices = @transform_5, window_bounds = array<i64: 1, 128>}, {pipeline_mode = #tpu.pipeline_mode<synchronous>, transform_indices = @transform_6, window_bounds = array<i64: 128, 128>}, {pipeline_mode = #tpu.pipeline_mode<synchronous>, transform_indices = @transform_7, window_bounds = array<i64: 1, 128>}, {pipeline_mode = #tpu.pipeline_mode<synchronous>, transform_indices = @transform_8, window_bounds = array<i64: 128, 128>}]} {
    %c0 = arith.constant 0 : index
    %c0_0 = arith.constant 0 : index
    %0 = vector.load %arg2[%c0, %c0_0] : memref<128x128xbf16, #tpu.memory_space<vmem>>, vector<128x128xbf16>
    %c0_1 = arith.constant 0 : index
    %c0_2 = arith.constant 0 : index
    %1 = vector.load %arg1[%c0_1, %c0_2] : memref<128x128xbf16, #tpu.memory_space<vmem>>, vector<128x128xbf16>
    %c0_3 = arith.constant 0 : index
    %c0_4 = arith.constant 0 : index
    %2 = vector.load %arg3[%c0_3, %c0_4] : memref<128x128xbf16, #tpu.memory_space<vmem>>, vector<128x128xbf16>
    %cst = arith.constant dense<0.000000e+00> : vector<128x128xf32>
    %3 = tpu.matmul %1, %2, %cst {dimension_numbers = #tpu.dot_dimension_numbers<[1], [0], [0], [1], [0, 0, 1, 1], [], []>} : vector<128x128xbf16>, vector<128x128xbf16>, vector<128x128xf32> -> vector<128x128xf32>
    %4 = arith.truncf %3 : vector<128x128xf32> to vector<128x128xbf16>
    %cst_5 = arith.constant dense<0.000000e+00> : vector<128x128xf32>
    %5 = tpu.matmul %0, %4, %cst_5 {dimension_numbers = #tpu.dot_dimension_numbers<[1], [0], [0], [1], [0, 0, 1, 1], [], []>} : vector<128x128xbf16>, vector<128x128xbf16>, vector<128x128xf32> -> vector<128x128xf32>
    %c0_6 = arith.constant 0 : index
    %c0_7 = arith.constant 0 : index
    %6 = vector.load %arg4[%c0_6, %c0_7] : memref<1x128xf32, #tpu.memory_space<vmem>>, vector<1x128xf32>
    %7 = vector.broadcast %6 : vector<1x128xf32> to vector<128x128xf32>
    %8 = arith.addf %5, %7 : vector<128x128xf32>
    %cst_8 = arith.constant 0.000000e+00 : f32
    %9 = vector.broadcast %cst_8 : f32 to vector<128x128xf32>
    %10 = arith.maximumf %8, %9 : vector<128x128xf32>
    %11 = arith.truncf %10 : vector<128x128xf32> to vector<128x128xbf16>
    %c0_9 = arith.constant 0 : index
    %c0_10 = arith.constant 0 : index
    %12 = vector.load %arg5[%c0_9, %c0_10] : memref<128x128xbf16, #tpu.memory_space<vmem>>, vector<128x128xbf16>
    %cst_11 = arith.constant dense<0.000000e+00> : vector<128x128xf32>
    %13 = tpu.matmul %11, %12, %cst_11 {dimension_numbers = #tpu.dot_dimension_numbers<[1], [0], [0], [1], [0, 0, 1, 1], [], []>} : vector<128x128xbf16>, vector<128x128xbf16>, vector<128x128xf32> -> vector<128x128xf32>
    %14 = arith.truncf %13 : vector<128x128xf32> to vector<128x128xbf16>
    %cst_12 = arith.constant dense<0.000000e+00> : vector<128x128xf32>
    %15 = tpu.matmul %0, %14, %cst_12 {dimension_numbers = #tpu.dot_dimension_numbers<[1], [0], [0], [1], [0, 0, 1, 1], [], []>} : vector<128x128xbf16>, vector<128x128xbf16>, vector<128x128xf32> -> vector<128x128xf32>
    %c0_13 = arith.constant 0 : index
    %c0_14 = arith.constant 0 : index
    %16 = vector.load %arg6[%c0_13, %c0_14] : memref<1x128xf32, #tpu.memory_space<vmem>>, vector<1x128xf32>
    %17 = vector.broadcast %16 : vector<1x128xf32> to vector<128x128xf32>
    %18 = arith.addf %15, %17 : vector<128x128xf32>
    %19 = arith.truncf %18 : vector<128x128xf32> to vector<128x128xbf16>
    %c0_15 = arith.constant 0 : index
    %c0_16 = arith.constant 0 : index
    %20 = vector.load %arg7[%c0_15, %c0_16] : memref<128x128xbf16, #tpu.memory_space<vmem>>, vector<128x128xbf16>
    %cst_17 = arith.constant dense<0.000000e+00> : vector<128x128xf32>
    %21 = tpu.matmul %19, %20, %cst_17 {dimension_numbers = #tpu.dot_dimension_numbers<[1], [0], [0], [1], [0, 0, 1, 1], [], []>} : vector<128x128xbf16>, vector<128x128xbf16>, vector<128x128xf32> -> vector<128x128xf32>
    %c0_18 = arith.constant 0 : index
    %c0_19 = arith.constant 0 : index
    %22 = vector.load %arg8[%c0_18, %c0_19] : memref<1x128xf32, #tpu.memory_space<vmem>>, vector<1x128xf32>
    %23 = vector.broadcast %22 : vector<1x128xf32> to vector<128x128xf32>
    %24 = arith.addf %21, %23 : vector<128x128xf32>
    %c0_20 = arith.constant 0 : index
    %c0_21 = arith.constant 0 : index
    %25 = vector.load %arg9[%c0_20, %c0_21] : memref<128x128xf32, #tpu.memory_space<vmem>>, vector<128x128xf32>
    tpu.vector_store %arg9[%c0_20, %c0_21], %24 {strides = array<i32>} : memref<128x128xf32, #tpu.memory_space<vmem>>, vector<128x128xf32>,
    return
  }
  func.func @transform_0(%arg0: i32) -> (i32, i32) {
    %c0_i32 = arith.constant 0 : i32
    %c0_i32_0 = arith.constant 0 : i32
    %c0_i32_1 = arith.constant 0 : i32
    return %c0_i32, %c0_i32_0 : i32, i32
  }
  func.func @transform_1(%arg0: i32) -> (i32, i32) {
    %c0_i32 = arith.constant 0 : i32
    %c0_i32_0 = arith.constant 0 : i32
    %c0_i32_1 = arith.constant 0 : i32
    return %c0_i32, %c0_i32_0 : i32, i32
  }
  func.func @transform_2(%arg0: i32) -> (i32, i32) {
    %c0_i32 = arith.constant 0 : i32
    %c0_i32_0 = arith.constant 0 : i32
    %c0_i32_1 = arith.constant 0 : i32
    return %c0_i32, %c0_i32_0 : i32, i32
  }
  func.func @transform_3(%arg0: i32) -> (i32, i32) {
    %c0_i32 = arith.constant 0 : i32
    %c0_i32_0 = arith.constant 0 : i32
    %c0_i32_1 = arith.constant 0 : i32
    return %c0_i32, %c0_i32_0 : i32, i32
  }
  func.func @transform_4(%arg0: i32) -> (i32, i32) {
    %c0_i32 = arith.constant 0 : i32
    %c0_i32_0 = arith.constant 0 : i32
    %c0_i32_1 = arith.constant 0 : i32
    return %c0_i32, %c0_i32_0 : i32, i32
  }
  func.func @transform_5(%arg0: i32) -> (i32, i32) {
    %c0_i32 = arith.constant 0 : i32
    %c0_i32_0 = arith.constant 0 : i32
    %c0_i32_1 = arith.constant 0 : i32
    return %c0_i32, %c0_i32_0 : i32, i32
  }
  func.func @transform_6(%arg0: i32) -> (i32, i32) {
    %c0_i32 = arith.constant 0 : i32
    %c0_i32_0 = arith.constant 0 : i32
    %c0_i32_1 = arith.constant 0 : i32
    return %c0_i32, %c0_i32_0 : i32, i32
  }
  func.func @transform_7(%arg0: i32) -> (i32, i32) {
    %c0_i32 = arith.constant 0 : i32
    %c0_i32_0 = arith.constant 0 : i32
    %c0_i32_1 = arith.constant 0 : i32
    return %c0_i32, %c0_i32_0 : i32, i32
  }
  func.func @transform_8(%arg0: i32) -> (i32, i32) {
    %c0_i32 = arith.constant 0 : i32
    %c0_i32_0 = arith.constant 0 : i32
    %c0_i32_1 = arith.constant 0 : i32
    return %c0_i32, %c0_i32_0 : i32, i32
  }
}

</mosaic_0001>

<bundles_post_ra>
// kernel: cross_omics_gcn_forward.1
= control target key start
LH: loop header
LB: loop body
LE: loop exit
PB: predicated region body
PF: predicated region fallthrough
CT: control target
= control target key end

     0   :  { %13 = vsyncpa [#allocation3], 0  ;;  %s1620_s0 = inlined_call_operand.vmem [shape: bf16[128,128], index: 0, kind: input, shape index: {}]   ;;  %s1621_s1 = inlined_call_operand.vmem [shape: bf16[128,128], index: 1, kind: input, shape index: {}]   ;;  %s1622_s2 = inlined_call_operand.hbm [shape: bf16[128,128], index: 2, kind: input, shape index: {}]   ;;  %s1623_s3 = inlined_call_operand.vmem [shape: f32[1,128], index: 3, kind: input, shape index: {}]   ;;  %s1624_s4 = inlined_call_operand.hbm [shape: bf16[128,128], index: 4, kind: input, shape index: {}]   ;;  %s1625_s5 = inlined_call_operand.vmem [shape: f32[1,128], index: 5, kind: input, shape index: {}]   ;;  %s1626_s6 = inlined_call_operand.hbm [shape: bf16[128,128], index: 6, kind: input, shape index: {}]   ;;  %s1627_s7 = inlined_call_operand.vmem [shape: f32[1,128], index: 7, kind: input, shape index: {}]   ;;  %s1628_s8 = inlined_call_operand.vmem [shape: f32[128,128], index: 8, kind: output, shape index: {}]  }
   0x1   :  { %14 = vsyncpa [#allocation5], 0  ;;  %s1381_s27 = smov [#allocation4]   ;;  %s1382_s29 = smov [#allocation2]  }
   0x2   :  { %s38_s28 = sshll.u32 %s1381_s27, 4  ;;  %s24_s30 = sshll.u32 %s1382_s29, 4  ;;  %s39_s28 = int_to_ptr.vmem [resolvable:$true] %s38_s28  ;;  %s1431_s30 = int_to_ptr.vmem [resolvable:$true] %s24_s30 }
   0x3   :  { %s1311_s11 = scalar_lea.hbm %s1624_s4, 1024 }
   0x4   :  { %p1312_p0 = scmp.ne.s32.totalorder %s1624_s4, %s1311_s11  ;;  %p1315_p1 = scmp.lt.u32.totalorder %s1311_s11, %s1624_s4 }
   0x6   :  { %p1317_p2 = pnand %p1315_p1, %p1312_p0 }
   0x8   :  { %1320 = shalt.err (!%p1317_p2)
}
   0x9   :  { %s1321_s16 = scalar_lea.vmem %s39_s28, 1024  ;;  %p1326_p4 = scmp.lt.s32.totalorder %s39_s28, %s39_s28 }
   0xa   :  { %p1322_p3 = scmp.ne.s32.totalorder %s39_s28, %s1321_s16  ;;  %p1327_p5 = scmp.lt.s32.totalorder %s1321_s16, %s1321_s16 }
   0xc   :  { %p1328_p6 = por %p1327_p5, %p1326_p4 }
   0xe   :  { %p1329_p7 = pnand %p1328_p6, %p1322_p3 }
  0x10   :  { %1332 = shalt.err (!%p1329_p7)
}
  0x11   :  { %s1383_s17 = smov 64   ;;  %s1384_s18 = smov 4  }
  0x12   :  { %44 = dma.hbm_to_vmem [thread:$0]  %s1624_s4, 1024, %s39_s28, [#allocation5], %s1383_s17, %s1383_s17, %s1384_s18  }
  0x13   :  { %s1333_s23 = scalar_lea.hbm %s1622_s2, 1024 }
  0x14   :  { %p1334_p8 = scmp.ne.s32.totalorder %s1622_s2, %s1333_s23  ;;  %p1337_p9 = scmp.lt.u32.totalorder %s1333_s23, %s1622_s2 }
  0x16   :  { %p1339_p10 = pnand %p1337_p9, %p1334_p8 }
  0x18   :  { %1342 = shalt.err (!%p1339_p10)
}
  0x19   :  { %s1343_s29 = scalar_lea.vmem %s1431_s30, 1024  ;;  %p1348_p12 = scmp.lt.s32.totalorder %s1431_s30, %s1431_s30 }
  0x1a   :  { %p1344_p11 = scmp.ne.s32.totalorder %s1431_s30, %s1343_s29  ;;  %p1349_p13 = scmp.lt.s32.totalorder %s1343_s29, %s1343_s29 }
  0x1c   :  { %p1350_p0 = por %p1349_p13, %p1348_p12 }
  0x1e   :  { %p1351_p1 = pnand %p1350_p0, %p1344_p11 }
  0x20   :  { %1354 = shalt.err (!%p1351_p1)
}
  0x21   :  { %30 = dma.hbm_to_vmem [thread:$0]  %s1622_s2, 1024, %s1431_s30, [#allocation3], %s1383_s17, %s1383_s17, %s1384_s18  }
  0x22   :  { %s1385_s9 = smov [#allocation6]   ;;  %s1355_s13 = scalar_lea.hbm %s1626_s6, 1024 }
  0x23   :  { %s52_s10 = sshll.u32 %s1385_s9, 4  ;;  %p1356_p2 = scmp.ne.s32.totalorder %s1626_s6, %s1355_s13  ;;  %s53_s10 = int_to_ptr.vmem [resolvable:$true] %s52_s10 }
  0x24   :  { %p1359_p3 = scmp.lt.u32.totalorder %s1355_s13, %s1626_s6 }
  0x26   :  { %p1361_p4 = pnand %p1359_p3, %p1356_p2 }
  0x28   :  { %1364 = shalt.err (!%p1361_p4)
}
  0x29   :  { %s1365_s20 = scalar_lea.vmem %s53_s10, 1024  ;;  %p1370_p6 = scmp.lt.s32.totalorder %s53_s10, %s53_s10 }
  0x2a   :  { %p1366_p5 = scmp.ne.s32.totalorder %s53_s10, %s1365_s20  ;;  %p1371_p7 = scmp.lt.s32.totalorder %s1365_s20, %s1365_s20 }
  0x2c   :  { %p1372_p8 = por %p1371_p7, %p1370_p6 }
  0x2e   :  { %p1373_p9 = pnand %p1372_p8, %p1366_p5 }
  0x30   :  { %1376 = shalt.err (!%p1373_p9)
}
  0x31   :  { %58 = dma.hbm_to_vmem [thread:$0]  %s1626_s6, 1024, %s53_s10, [#allocation5], %s1383_s17, %s1383_s17, %s1384_s18  }
  0x32   :  { %1377 = dma.done.wait [#allocation3], 1024  }
  0x33   :  { %1378 = vsyncadd [#allocation3], 4294966272 }
  0x34   :  { %1379 = dma.done.wait [#allocation5], 2048  }
  0x35   :  { %1380 = vsyncadd [#allocation5], 4294965248  ;;  %v1271_v0 = vld [vmem:[#allocation2] sm:$0xff]   ;;  %v1272_v1 = vld [vmem:[#allocation2 + $0x8] sm:$0xff]  }
  0x36   :  { %1090 = vmatprep.subr.bf16.mxu0 %v1271_v0  ;;  %v1273_v2 = vld [vmem:[#allocation2 + $0x10] sm:$0xff]   ;;  %v1274_v3 = vld [vmem:[#allocation2 + $0x18] sm:$0xff]   ;;  %v1279_v4 = vld [vmem:[%s1620_s0] sm:$0xff]  }
  0x37   :  { %1091 = vmatpush3.bf16.msra.mxu0 %v1271_v0  ;;  %1106 = vmatprep.mubr.bf16.mxu0 %v1279_v4  ;;  %v1275_v5 = vld [vmem:[#allocation2 + $0x20] sm:$0xff]   ;;  %v1276_v6 = vld [vmem:[#allocation2 + $0x28] sm:$0xff]   ;;  %v1277_v7 = vld [vmem:[#allocation2 + $0x30] sm:$0xff]  }
  0x38   :  { %1092 = vmatprep.subr.bf16.mxu0 %v1272_v1  ;;  %v1278_v8 = vld [vmem:[#allocation2 + $0x38] sm:$0xff]   ;;  %v1280_v9 = vld [vmem:[%s1620_s0 + $0x8] sm:$0xff]   ;;  %v1281_v10 = vld [vmem:[%s1620_s0 + $0x10] sm:$0xff]  }
  0x39   :  { %v1282_v11 = vld [vmem:[%s1620_s0 + $0x18] sm:$0xff]   ;;  %v1283_v12 = vld [vmem:[%s1620_s0 + $0x20] sm:$0xff]   ;;  %v1284_v13 = vld [vmem:[%s1620_s0 + $0x28] sm:$0xff]  }
  0x3a   :  { %v1285_v14 = vld [vmem:[%s1620_s0 + $0x30] sm:$0xff]   ;;  %v1286_v15 = vld [vmem:[%s1620_s0 + $0x38] sm:$0xff]   ;;  %v1510_v16 = vld [vmem:[%s1621_s1] sm:$0xff]  }
  0x3b   :  { %1093 = vmatpush3.bf16.msra.mxu0 %v1272_v1  ;;  %1138 = vmatprep.mubr.bf16.mxu1 %v1510_v16  ;;  %v1295_v17 = vld [vmem:[#allocation4] sm:$0xff]   ;;  %v1296_v18 = vld [vmem:[#allocation4 + $0x8] sm:$0xff]   ;;  %v1297_v19 = vld [vmem:[#allocation4 + $0x10] sm:$0xff]  }
  0x3c   :  { %1094 = vmatprep.subr.bf16.mxu0 %v1273_v2  ;;  %v1298_v20 = vld [vmem:[#allocation4 + $0x18] sm:$0xff]   ;;  %v1299_v21 = vld [vmem:[#allocation4 + $0x20] sm:$0xff]   ;;  %v1300_v22 = vld [vmem:[#allocation4 + $0x28] sm:$0xff]  }
  0x3d   :  { %v1516_v47 = vld [vmem:[%s1621_s1 + $0x8] sm:$0xff]   ;;  %v1521_v48 = vld [vmem:[%s1621_s1 + $0x10] sm:$0xff]   ;;  %v1528_v49 = vld [vmem:[%s1621_s1 + $0x18] sm:$0xff]  }
  0x3e   :  { %v1533_v50 = vld [vmem:[%s1621_s1 + $0x20] sm:$0xff]   ;;  %v1540_v51 = vld [vmem:[%s1621_s1 + $0x28] sm:$0xff]   ;;  %v1545_v52 = vld [vmem:[%s1621_s1 + $0x30] sm:$0xff]  }
  0x3f   :  { %1095 = vmatpush3.bf16.msra.mxu0 %v1273_v2  ;;  %v1552_v53 = vld [vmem:[%s1621_s1 + $0x38] sm:$0xff]   ;;  %v1301_v54 = vld [vmem:[#allocation4 + $0x30] sm:$0xff]   ;;  %v983_v56 = vld [vmem:[%s1623_s3] ss:$0 sm:$0xff] }
  0x40   :  { %1096 = vmatprep.subr.bf16.mxu0 %v1274_v3  ;;  %v1302_v55 = vld [vmem:[#allocation4 + $0x38] sm:$0xff]  }
  0x43   :  { %1097 = vmatpush3.bf16.msra.mxu0 %v1274_v3 }
  0x44   :  { %1098 = vmatprep.subr.bf16.mxu0 %v1275_v5 }
  0x47   :  { %1099 = vmatpush3.bf16.msra.mxu0 %v1275_v5 }
  0x48   :  { %1100 = vmatprep.subr.bf16.mxu0 %v1276_v6 }
  0x4b   :  { %1101 = vmatpush3.bf16.msra.mxu0 %v1276_v6 }
  0x4c   :  { %1102 = vmatprep.subr.bf16.mxu0 %v1277_v7 }
  0x4f   :  { %1103 = vmatpush3.bf16.msra.mxu0 %v1277_v7 }
  0x50   :  { %1104 = vmatprep.subr.bf16.mxu0 %v1278_v8 }
  0x53   :  { %1105 = vmatpush3.bf16.msra.mxu0 %v1278_v8 }
  0x54   :  { %1154 = vmatprep.subr.bf16.mxu0 %v1295_v17 }
  0x56   :  { %1107 = vmatmul.mubr.bf16.vlgmr.msra.gmra.mrb[0].mxu0 %v1280_v9 }
  0x57   :  { %1110 = vmatprep.mubr.bf16.mxu0 %v1281_v10  ;;  %1155 = vmatpush3.bf16.msra.mxu0 %v1295_v17 }
  0x58   :  { %1156 = vmatprep.subr.bf16.mxu0 %v1296_v18 }
  0x5b   :  { %1157 = vmatpush3.bf16.msra.mxu0 %v1296_v18 }
  0x5c   :  { %1158 = vmatprep.subr.bf16.mxu0 %v1297_v19 }
  0x5e   :  { %1111 = vmatmul.mubr.bf16.gmra.mrb[4].mxu0 %v1282_v11 }
  0x5f   :  { %1114 = vmatprep.mubr.bf16.mxu0 %v1283_v12  ;;  %1159 = vmatpush3.bf16.msra.mxu0 %v1297_v19 }
  0x60   :  { %1160 = vmatprep.subr.bf16.mxu0 %v1298_v20 }
  0x63   :  { %1161 = vmatpush3.bf16.msra.mxu0 %v1298_v20 }
  0x64   :  { %1162 = vmatprep.subr.bf16.mxu0 %v1299_v21 }
  0x66   :  { %1115 = vmatmul.mubr.bf16.gmra.mrb[8].mxu0 %v1284_v13 }
  0x67   :  { %1118 = vmatprep.mubr.bf16.mxu0 %v1285_v14  ;;  %1163 = vmatpush3.bf16.msra.mxu0 %v1299_v21 }
  0x68   :  { %1164 = vmatprep.subr.bf16.mxu0 %v1300_v22 }
  0x6b   :  { %1165 = vmatpush3.bf16.msra.mxu0 %v1300_v22 }
  0x6c   :  { %1166 = vmatprep.subr.bf16.mxu0 %v1301_v54 }
  0x6e   :  { %1119 = vmatmul.mubr.bf16.gmra.mrb[12].mxu0 %v1286_v15 }
  0x6f   :  { %1167 = vmatpush3.bf16.msra.mxu0 %v1301_v54 }
  0x70   :  { %1168 = vmatprep.subr.bf16.mxu0 %v1302_v55 }
  0x73   :  { %1169 = vmatpush3.bf16.msra.mxu0 %v1302_v55 }
 0x129   :  { %v1108_v23 = vpop.f32.mrb[0].mxu0 }
 0x12a   :  { %v249_v24 = vpop.f32.mrb[1].mxu0 }
 0x12b   :  { %v1109_v25 = vpop.f32.mrb[2].mxu0 }
 0x12c   :  { %v313_v26 = vpack.c.bf16 %v1109_v25, %v1108_v23  ;;  %v252_v27 = vpop.f32.mrb[3].mxu0 }
 0x12d   :  { %v312_v28 = vpack.c.bf16 %v252_v27, %v249_v24 }
 0x12f   :  { %1122 = vmatprep.subr.bf16.mxu1 %v312_v28 }
 0x130   :  { %1123 = vmatpush3.bf16.msra.mxu1 %v312_v28 }
 0x131   :  { %v1112_v29 = vpop.f32.mrb[4].mxu0  ;;  %1124 = vmatprep.subr.bf16.mxu1 %v313_v26 }
 0x132   :  { %v265_v30 = vpop.f32.mrb[5].mxu0 }
 0x133   :  { %v1113_v31 = vpop.f32.mrb[6].mxu0 }
 0x134   :  { %v315_v32 = vpack.c.bf16 %v1113_v31, %v1112_v29  ;;  %v268_v33 = vpop.f32.mrb[7].mxu0  ;;  %1125 = vmatpush3.bf16.msra.mxu1 %v313_v26 }
 0x135   :  { %v314_v34 = vpack.c.bf16 %v268_v33, %v265_v30 }
 0x137   :  { %1126 = vmatprep.subr.bf16.mxu1 %v314_v34 }
 0x138   :  { %1127 = vmatpush3.bf16.msra.mxu1 %v314_v34 }
 0x139   :  { %v1116_v35 = vpop.f32.mrb[8].mxu0  ;;  %1128 = vmatprep.subr.bf16.mxu1 %v315_v32 }
 0x13a   :  { %v281_v36 = vpop.f32.mrb[9].mxu0 }
 0x13b   :  { %v1117_v37 = vpop.f32.mrb[10].mxu0 }
 0x13c   :  { %v317_v38 = vpack.c.bf16 %v1117_v37, %v1116_v35  ;;  %v284_v39 = vpop.f32.mrb[11].mxu0  ;;  %1129 = vmatpush3.bf16.msra.mxu1 %v315_v32 }
 0x13d   :  { %v316_v40 = vpack.c.bf16 %v284_v39, %v281_v36 }
 0x13f   :  { %1130 = vmatprep.subr.bf16.mxu1 %v316_v40 }
 0x140   :  { %1131 = vmatpush3.bf16.msra.mxu1 %v316_v40 }
 0x141   :  { %v1120_v41 = vpop.f32.mrb[12].mxu0  ;;  %1132 = vmatprep.subr.bf16.mxu1 %v317_v38 }
 0x142   :  { %v297_v42 = vpop.f32.mrb[13].mxu0 }
 0x143   :  { %v1121_v43 = vpop.f32.mrb[14].mxu0 }
 0x144   :  { %v319_v44 = vpack.c.bf16 %v1121_v43, %v1120_v41  ;;  %v300_v45 = vpop.f32.mrb[15].mxu0  ;;  %1133 = vmatpush3.bf16.msra.mxu1 %v317_v38 }
 0x145   :  { %v318_v46 = vpack.c.bf16 %v300_v45, %v297_v42 }
 0x147   :  { %1134 = vmatprep.subr.bf16.mxu1 %v318_v46 }
 0x148   :  { %1135 = vmatpush3.bf16.msra.mxu1 %v318_v46 }
 0x149   :  { %1136 = vmatprep.subr.bf16.mxu1 %v319_v44 }
 0x14c   :  { %1137 = vmatpush3.bf16.msra.mxu1 %v319_v44 }
 0x14f   :  { %1139 = vmatmul.mubr.bf16.vlgmr.msra.gmra.mrb[0].mxu1 %v1516_v47 }
 0x150   :  { %1142 = vmatprep.mubr.bf16.mxu1 %v1521_v48 }
 0x157   :  { %1143 = vmatmul.mubr.bf16.gmra.mrb[4].mxu1 %v1528_v49 }
 0x158   :  { %1146 = vmatprep.mubr.bf16.mxu1 %v1533_v50 }
 0x15f   :  { %1147 = vmatmul.mubr.bf16.gmra.mrb[8].mxu1 %v1540_v51 }
 0x160   :  { %1150 = vmatprep.mubr.bf16.mxu1 %v1545_v52 }
 0x167   :  { %1151 = vmatmul.mubr.bf16.gmra.mrb[12].mxu1 %v1552_v53 }
 0x168   :  { %1202 = vmatprep.mubr.bf16.mxu1 %v1510_v16 }
 0x222   :  { %v1140_v57 = vpop.f32.mrb[0].mxu1 }
 0x223   :  { %v418_v58 = vadd.f32 %v1140_v57, %v983_v56  ;;  %v409_v59 = vpop.f32.mrb[1].mxu1  ;;  %v1303_v57 = vld [vmem:[#allocation6] sm:$0xff]  }
 0x224   :  { %v410_v60 = vadd.f32 %v983_v56, %v409_v59  ;;  %v1141_v61 = vpop.f32.mrb[2].mxu1  ;;  %1218 = vmatprep.subr.bf16.mxu0 %v1303_v57  ;;  %v1305_v59 = vld [vmem:[#allocation6 + $0x10] sm:$0xff]  }
 0x225   :  { %v421_v62 = vadd.f32 %v1141_v61, %v983_v56  ;;  %v412_v63 = vpop.f32.mrb[3].mxu1  ;;  %v474_v1 = vmax.f32 %v418_v58, 0.0  ;;  %v1304_v58 = vld [vmem:[#allocation6 + $0x8] sm:$0xff]  }
 0x226   :  { %v413_v0 = vadd.f32 %v983_v56, %v412_v63  ;;  %v472_v3 = vmax.f32 %v410_v60, 0.0  ;;  %v1306_v60 = vld [vmem:[#allocation6 + $0x18] sm:$0xff]   ;;  %v1308_v61 = vld [vmem:[#allocation6 + $0x28] sm:$0xff]  }
 0x227   :  { %v475_v2 = vmax.f32 %v421_v62, 0.0 }
 0x228   :  { %v473_v4 = vmax.f32 %v413_v0, 0.0 }
 0x229   :  { %v489_v5 = vpack.c.bf16 %v475_v2, %v474_v1 }
 0x22a   :  { %v488_v6 = vpack.c.bf16 %v473_v4, %v472_v3  ;;  %v1144_v7 = vpop.f32.mrb[4].mxu1 }
 0x22b   :  { %v434_v8 = vadd.f32 %v1144_v7, %v983_v56  ;;  %v425_v9 = vpop.f32.mrb[5].mxu1 }
 0x22c   :  { %v426_v10 = vadd.f32 %v983_v56, %v425_v9  ;;  %v1145_v11 = vpop.f32.mrb[6].mxu1  ;;  %1170 = vmatprep.mubr.bf16.mxu0 %v488_v6 }
 0x22d   :  { %v437_v12 = vadd.f32 %v1145_v11, %v983_v56  ;;  %v428_v13 = vpop.f32.mrb[7].mxu1  ;;  %1171 = vmatmul.mubr.bf16.vlgmr.msra.gmra.mrb[16].mxu0 %v489_v5  ;;  %v478_v15 = vmax.f32 %v434_v8, 0.0 }
 0x22e   :  { %v429_v14 = vadd.f32 %v983_v56, %v428_v13  ;;  %v476_v17 = vmax.f32 %v426_v10, 0.0  ;;  %1219 = vmatpush3.bf16.msra.mxu0 %v1303_v57 }
 0x22f   :  { %v479_v16 = vmax.f32 %v437_v12, 0.0  ;;  %1220 = vmatprep.subr.bf16.mxu0 %v1304_v58 }
 0x230   :  { %v477_v18 = vmax.f32 %v429_v14, 0.0 }
 0x231   :  { %v491_v19 = vpack.c.bf16 %v479_v16, %v478_v15 }
 0x232   :  { %v490_v20 = vpack.c.bf16 %v477_v18, %v476_v17  ;;  %v1148_v21 = vpop.f32.mrb[8].mxu1  ;;  %1221 = vmatpush3.bf16.msra.mxu0 %v1304_v58 }
 0x233   :  { %v450_v22 = vadd.f32 %v1148_v21, %v983_v56  ;;  %v441_v23 = vpop.f32.mrb[9].mxu1  ;;  %1222 = vmatprep.subr.bf16.mxu0 %v1305_v59 }
 0x234   :  { %v442_v24 = vadd.f32 %v983_v56, %v441_v23  ;;  %v1149_v25 = vpop.f32.mrb[10].mxu1  ;;  %1174 = vmatprep.mubr.bf16.mxu0 %v490_v20 }
 0x235   :  { %v453_v26 = vadd.f32 %v1149_v25, %v983_v56  ;;  %v444_v27 = vpop.f32.mrb[11].mxu1  ;;  %1175 = vmatmul.mubr.bf16.gmra.mrb[20].mxu0 %v491_v19  ;;  %v482_v29 = vmax.f32 %v450_v22, 0.0 }
 0x236   :  { %v445_v28 = vadd.f32 %v983_v56, %v444_v27  ;;  %v480_v31 = vmax.f32 %v442_v24, 0.0  ;;  %1223 = vmatpush3.bf16.msra.mxu0 %v1305_v59 }
 0x237   :  { %v483_v30 = vmax.f32 %v453_v26, 0.0  ;;  %1224 = vmatprep.subr.bf16.mxu0 %v1306_v60 }
 0x238   :  { %v481_v32 = vmax.f32 %v445_v28, 0.0 }
 0x239   :  { %v493_v33 = vpack.c.bf16 %v483_v30, %v482_v29 }
 0x23a   :  { %v492_v34 = vpack.c.bf16 %v481_v32, %v480_v31  ;;  %v1152_v35 = vpop.f32.mrb[12].mxu1  ;;  %1225 = vmatpush3.bf16.msra.mxu0 %v1306_v60 }
 0x23b   :  { %v466_v36 = vadd.f32 %v1152_v35, %v983_v56  ;;  %v457_v37 = vpop.f32.mrb[13].mxu1 }
 0x23c   :  { %v458_v38 = vadd.f32 %v983_v56, %v457_v37  ;;  %v1153_v39 = vpop.f32.mrb[14].mxu1  ;;  %1178 = vmatprep.mubr.bf16.mxu0 %v492_v34 }
 0x23d   :  { %v469_v40 = vadd.f32 %v1153_v39, %v983_v56  ;;  %v460_v41 = vpop.f32.mrb[15].mxu1  ;;  %1179 = vmatmul.mubr.bf16.gmra.mrb[24].mxu0 %v493_v33  ;;  %v486_v43 = vmax.f32 %v466_v36, 0.0 }
 0x23e   :  { %v461_v42 = vadd.f32 %v983_v56, %v460_v41  ;;  %v484_v45 = vmax.f32 %v458_v38, 0.0  ;;  %v1307_v56 = vld [vmem:[#allocation6 + $0x20] sm:$0xff]  }
 0x23f   :  { %v487_v44 = vmax.f32 %v469_v40, 0.0  ;;  %1226 = vmatprep.subr.bf16.mxu0 %v1307_v56 }
 0x240   :  { %v485_v46 = vmax.f32 %v461_v42, 0.0  ;;  %1227 = vmatpush3.bf16.msra.mxu0 %v1307_v56 }
 0x241   :  { %v495_v54 = vpack.c.bf16 %v487_v44, %v486_v43  ;;  %1228 = vmatprep.subr.bf16.mxu0 %v1308_v61 }
 0x242   :  { %v494_v55 = vpack.c.bf16 %v485_v46, %v484_v45 }
 0x244   :  { %1182 = vmatprep.mubr.bf16.mxu0 %v494_v55  ;;  %1229 = vmatpush3.bf16.msra.mxu0 %v1308_v61 }
 0x245   :  { %1183 = vmatmul.mubr.bf16.gmra.mrb[28].mxu0 %v495_v54 }
 0x300   :  { %v1172_v62 = vpop.f32.mrb[16].mxu0 }
 0x301   :  { %v594_v63 = vpop.f32.mrb[17].mxu0 }
 0x302   :  { %v1173_v0 = vpop.f32.mrb[18].mxu0 }
 0x303   :  { %v658_v1 = vpack.c.bf16 %v1173_v0, %v1172_v62  ;;  %v597_v2 = vpop.f32.mrb[19].mxu0 }
 0x304   :  { %v657_v3 = vpack.c.bf16 %v597_v2, %v594_v63 }
 0x306   :  { %1186 = vmatprep.subr.bf16.mxu1 %v657_v3 }
 0x307   :  { %1187 = vmatpush3.bf16.msra.mxu1 %v657_v3 }
 0x308   :  { %v1176_v4 = vpop.f32.mrb[20].mxu0  ;;  %1188 = vmatprep.subr.bf16.mxu1 %v658_v1 }
 0x309   :  { %v610_v5 = vpop.f32.mrb[21].mxu0 }
 0x30a   :  { %v1177_v6 = vpop.f32.mrb[22].mxu0 }
 0x30b   :  { %v660_v7 = vpack.c.bf16 %v1177_v6, %v1176_v4  ;;  %v613_v8 = vpop.f32.mrb[23].mxu0  ;;  %1189 = vmatpush3.bf16.msra.mxu1 %v658_v1  ;;  %v1001_v1 = vld [vmem:[%s1627_s7] ss:$0 sm:$0xff] }
 0x30c   :  { %v659_v9 = vpack.c.bf16 %v613_v8, %v610_v5 }
 0x30e   :  { %1190 = vmatprep.subr.bf16.mxu1 %v659_v9 }
 0x30f   :  { %1191 = vmatpush3.bf16.msra.mxu1 %v659_v9 }
 0x310   :  { %v1180_v10 = vpop.f32.mrb[24].mxu0  ;;  %1192 = vmatprep.subr.bf16.mxu1 %v660_v7 }
 0x311   :  { %v626_v11 = vpop.f32.mrb[25].mxu0 }
 0x312   :  { %v1181_v12 = vpop.f32.mrb[26].mxu0 }
 0x313   :  { %v662_v13 = vpack.c.bf16 %v1181_v12, %v1180_v10  ;;  %v629_v14 = vpop.f32.mrb[27].mxu0  ;;  %1193 = vmatpush3.bf16.msra.mxu1 %v660_v7 }
 0x314   :  { %v661_v15 = vpack.c.bf16 %v629_v14, %v626_v11 }
 0x316   :  { %1194 = vmatprep.subr.bf16.mxu1 %v661_v15 }
 0x317   :  { %1195 = vmatpush3.bf16.msra.mxu1 %v661_v15 }
 0x318   :  { %v1184_v16 = vpop.f32.mrb[28].mxu0  ;;  %1196 = vmatprep.subr.bf16.mxu1 %v662_v13 }
 0x319   :  { %v642_v17 = vpop.f32.mrb[29].mxu0 }
 0x31a   :  { %v1185_v18 = vpop.f32.mrb[30].mxu0 }
 0x31b   :  { %v664_v19 = vpack.c.bf16 %v1185_v18, %v1184_v16  ;;  %v645_v20 = vpop.f32.mrb[31].mxu0  ;;  %1197 = vmatpush3.bf16.msra.mxu1 %v662_v13 }
 0x31c   :  { %v663_v21 = vpack.c.bf16 %v645_v20, %v642_v17 }
 0x31e   :  { %1198 = vmatprep.subr.bf16.mxu1 %v663_v21 }
 0x31f   :  { %1199 = vmatpush3.bf16.msra.mxu1 %v663_v21 }
 0x320   :  { %1200 = vmatprep.subr.bf16.mxu1 %v664_v19 }
 0x323   :  { %1201 = vmatpush3.bf16.msra.mxu1 %v664_v19 }
 0x324   :  { %1250 = vmatprep.subr.bf16.mxu1 %v1303_v57 }
 0x326   :  { %1203 = vmatmul.mubr.bf16.vlgmr.msra.gmra.mrb[16].mxu1 %v1516_v47  ;;  %v1309_v47 = vld [vmem:[#allocation6 + $0x30] sm:$0xff]  }
 0x327   :  { %1206 = vmatprep.mubr.bf16.mxu1 %v1521_v48  ;;  %1258 = vmatpush3.bf16.msra.mxu1 %v1303_v57  ;;  %v1310_v48 = vld [vmem:[#allocation6 + $0x38] sm:$0xff]  }
 0x328   :  { %1251 = vmatprep.subr.bf16.mxu1 %v1304_v58  ;;  %1230 = vmatprep.subr.bf16.mxu0 %v1309_v47 }
 0x329   :  { %1231 = vmatpush3.bf16.msra.mxu0 %v1309_v47 }
 0x32a   :  { %1232 = vmatprep.subr.bf16.mxu0 %v1310_v48 }
 0x32b   :  { %1259 = vmatpush3.bf16.msra.mxu1 %v1304_v58 }
 0x32c   :  { %1252 = vmatprep.subr.bf16.mxu1 %v1305_v59 }
 0x32d   :  { %1233 = vmatpush3.bf16.msra.mxu0 %v1310_v48 }
 0x32e   :  { %1207 = vmatmul.mubr.bf16.gmra.mrb[20].mxu1 %v1528_v49 }
 0x32f   :  { %1210 = vmatprep.mubr.bf16.mxu1 %v1533_v50  ;;  %1260 = vmatpush3.bf16.msra.mxu1 %v1305_v59  ;;  %v1000_v50 = vld [vmem:[%s1625_s5] ss:$0 sm:$0xff] }
 0x330   :  { %1253 = vmatprep.subr.bf16.mxu1 %v1306_v60 }
 0x333   :  { %1261 = vmatpush3.bf16.msra.mxu1 %v1306_v60 }
 0x334   :  { %1254 = vmatprep.subr.bf16.mxu1 %v1307_v56 }
 0x336   :  { %1211 = vmatmul.mubr.bf16.gmra.mrb[24].mxu1 %v1540_v51 }
 0x337   :  { %1214 = vmatprep.mubr.bf16.mxu1 %v1545_v52  ;;  %1262 = vmatpush3.bf16.msra.mxu1 %v1307_v56 }
 0x338   :  { %1255 = vmatprep.subr.bf16.mxu1 %v1308_v61 }
 0x33b   :  { %1263 = vmatpush3.bf16.msra.mxu1 %v1308_v61 }
 0x33c   :  { %1256 = vmatprep.subr.bf16.mxu1 %v1309_v47 }
 0x33e   :  { %1215 = vmatmul.mubr.bf16.gmra.mrb[28].mxu1 %v1552_v53 }
 0x33f   :  { %1264 = vmatpush3.bf16.msra.mxu1 %v1309_v47 }
 0x340   :  { %1257 = vmatprep.subr.bf16.mxu1 %v1310_v48 }
 0x343   :  { %1265 = vmatpush3.bf16.msra.mxu1 %v1310_v48 }
 0x3f9   :  { %v1204_v49 = vpop.f32.mrb[16].mxu1 }
 0x3fa   :  { %v706_v51 = vpop.f32.mrb[17].mxu1  ;;  %v715_v22 = vadd.f32 %v1204_v49, %v1000_v50 }
 0x3fb   :  { %v1205_v52 = vpop.f32.mrb[18].mxu1  ;;  %v707_v24 = vadd.f32 %v1000_v50, %v706_v51 }
 0x3fc   :  { %v718_v23 = vadd.f32 %v1205_v52, %v1000_v50  ;;  %v709_v53 = vpop.f32.mrb[19].mxu1 }
 0x3fd   :  { %v710_v25 = vadd.f32 %v1000_v50, %v709_v53 }
 0x3fe   :  { %v770_v26 = vpack.c.bf16 %v718_v23, %v715_v22 }
 0x3ff   :  { %v769_v27 = vpack.c.bf16 %v710_v25, %v707_v24 }
 0x401   :  { %v1208_v28 = vpop.f32.mrb[20].mxu1  ;;  %1234 = vmatprep.mubr.bf16.mxu0 %v769_v27 }
 0x402   :  { %v722_v29 = vpop.f32.mrb[21].mxu1  ;;  %1235 = vmatmul.mubr.bf16.vlgmr.msra.gmra.mrb[32].mxu0 %v770_v26  ;;  %v731_v31 = vadd.f32 %v1208_v28, %v1000_v50 }
 0x403   :  { %v1209_v30 = vpop.f32.mrb[22].mxu1  ;;  %v723_v34 = vadd.f32 %v1000_v50, %v722_v29 }
 0x404   :  { %v734_v32 = vadd.f32 %v1209_v30, %v1000_v50  ;;  %v725_v33 = vpop.f32.mrb[23].mxu1 }
 0x405   :  { %v726_v35 = vadd.f32 %v1000_v50, %v725_v33 }
 0x406   :  { %v772_v36 = vpack.c.bf16 %v734_v32, %v731_v31 }
 0x407   :  { %v771_v37 = vpack.c.bf16 %v726_v35, %v723_v34 }
 0x409   :  { %v1212_v38 = vpop.f32.mrb[24].mxu1  ;;  %1238 = vmatprep.mubr.bf16.mxu0 %v771_v37 }
 0x40a   :  { %v738_v39 = vpop.f32.mrb[25].mxu1  ;;  %1239 = vmatmul.mubr.bf16.gmra.mrb[36].mxu0 %v772_v36  ;;  %v747_v41 = vadd.f32 %v1212_v38, %v1000_v50 }
 0x40b   :  { %v1213_v40 = vpop.f32.mrb[26].mxu1  ;;  %v739_v44 = vadd.f32 %v1000_v50, %v738_v39 }
 0x40c   :  { %v750_v42 = vadd.f32 %v1213_v40, %v1000_v50  ;;  %v741_v43 = vpop.f32.mrb[27].mxu1 }
 0x40d   :  { %v742_v45 = vadd.f32 %v1000_v50, %v741_v43 }
 0x40e   :  { %v774_v46 = vpack.c.bf16 %v750_v42, %v747_v41 }
 0x40f   :  { %v773_v54 = vpack.c.bf16 %v742_v45, %v739_v44 }
 0x411   :  { %v1216_v55 = vpop.f32.mrb[28].mxu1  ;;  %1242 = vmatprep.mubr.bf16.mxu1 %v773_v54 }
 0x412   :  { %v754_v57 = vpop.f32.mrb[29].mxu1  ;;  %1243 = vmatmul.mubr.bf16.vlgmr.msra.gmra.mrb[32].mxu1 %v774_v46  ;;  %v763_v59 = vadd.f32 %v1216_v55, %v1000_v50 }
 0x413   :  { %v1217_v58 = vpop.f32.mrb[30].mxu1  ;;  %v755_v61 = vadd.f32 %v1000_v50, %v754_v57 }
 0x414   :  { %v766_v60 = vadd.f32 %v1217_v58, %v1000_v50  ;;  %v757_v56 = vpop.f32.mrb[31].mxu1 }
 0x415   :  { %v758_v62 = vadd.f32 %v1000_v50, %v757_v56 }
 0x416   :  { %v776_v63 = vpack.c.bf16 %v766_v60, %v763_v59 }
 0x417   :  { %v775_v0 = vpack.c.bf16 %v758_v62, %v755_v61 }
 0x419   :  { %1246 = vmatprep.mubr.bf16.mxu1 %v775_v0 }
 0x41a   :  { %1247 = vmatmul.mubr.bf16.gmra.mrb[36].mxu1 %v776_v63 }
 0x4d5   :  { %v1236_v2 = vpop.f32.mrb[32].mxu0 }
 0x4d6   :  { %v891_v3 = vadd.f32 %v1236_v2, %v1001_v1  ;;  %v882_v4 = vpop.f32.mrb[33].mxu0 }
 0x4d7   :  { %v883_v5 = vadd.f32 %v1001_v1, %v882_v4  ;;  %v1237_v6 = vpop.f32.mrb[34].mxu0 }
 0x4d8   :  { %947 = vst [vmem:[%s1628_s8 + $0x10] sm:$0xff] %v891_v3  ;;  %v894_v7 = vadd.f32 %v1237_v6, %v1001_v1  ;;  %v885_v8 = vpop.f32.mrb[35].mxu0 }
 0x4d9   :  { %945 = vst [vmem:[%s1628_s8] sm:$0xff] %v883_v5  ;;  %v886_v9 = vadd.f32 %v1001_v1, %v885_v8 }
 0x4da   :  { %948 = vst [vmem:[%s1628_s8 + $0x18] sm:$0xff] %v894_v7 }
 0x4db   :  { %946 = vst [vmem:[%s1628_s8 + $0x8] sm:$0xff] %v886_v9 }
 0x4dd   :  { %v1240_v10 = vpop.f32.mrb[36].mxu0 }
 0x4de   :  { %v907_v11 = vadd.f32 %v1240_v10, %v1001_v1  ;;  %v898_v12 = vpop.f32.mrb[37].mxu0 }
 0x4df   :  { %v899_v13 = vadd.f32 %v1001_v1, %v898_v12  ;;  %v1241_v14 = vpop.f32.mrb[38].mxu0 }
 0x4e0   :  { %951 = vst [vmem:[%s1628_s8 + $0x30] sm:$0xff] %v907_v11  ;;  %v910_v15 = vadd.f32 %v1241_v14, %v1001_v1  ;;  %v901_v16 = vpop.f32.mrb[39].mxu0 }
 0x4e1   :  { %949 = vst [vmem:[%s1628_s8 + $0x20] sm:$0xff] %v899_v13  ;;  %v902_v17 = vadd.f32 %v1001_v1, %v901_v16 }
 0x4e2   :  { %952 = vst [vmem:[%s1628_s8 + $0x38] sm:$0xff] %v910_v15 }
 0x4e3   :  { %950 = vst [vmem:[%s1628_s8 + $0x28] sm:$0xff] %v902_v17 }
 0x4e5   :  { %v1244_v18 = vpop.f32.mrb[32].mxu1 }
 0x4e6   :  { %v923_v19 = vadd.f32 %v1244_v18, %v1001_v1  ;;  %v914_v20 = vpop.f32.mrb[33].mxu1 }
 0x4e7   :  { %v915_v21 = vadd.f32 %v1001_v1, %v914_v20  ;;  %v1245_v47 = vpop.f32.mrb[34].mxu1 }
 0x4e8   :  { %955 = vst [vmem:[%s1628_s8 + $0x50] sm:$0xff] %v923_v19  ;;  %v926_v48 = vadd.f32 %v1245_v47, %v1001_v1  ;;  %v917_v49 = vpop.f32.mrb[35].mxu1 }
 0x4e9   :  { %953 = vst [vmem:[%s1628_s8 + $0x40] sm:$0xff] %v915_v21  ;;  %v918_v50 = vadd.f32 %v1001_v1, %v917_v49 }
 0x4ea   :  { %956 = vst [vmem:[%s1628_s8 + $0x58] sm:$0xff] %v926_v48 }
 0x4eb   :  { %954 = vst [vmem:[%s1628_s8 + $0x48] sm:$0xff] %v918_v50 }
 0x4ed   :  { %v1248_v51 = vpop.f32.mrb[36].mxu1 }
 0x4ee   :  { %v939_v52 = vadd.f32 %v1248_v51, %v1001_v1  ;;  %v930_v22 = vpop.f32.mrb[37].mxu1 }
 0x4ef   :  { %v931_v23 = vadd.f32 %v1001_v1, %v930_v22  ;;  %v1249_v53 = vpop.f32.mrb[38].mxu1 }
 0x4f0   :  { %959 = vst [vmem:[%s1628_s8 + $0x70] sm:$0xff] %v939_v52  ;;  %v942_v24 = vadd.f32 %v1249_v53, %v1001_v1  ;;  %v933_v25 = vpop.f32.mrb[39].mxu1 }
 0x4f1   :  { %957 = vst [vmem:[%s1628_s8 + $0x60] sm:$0xff] %v931_v23  ;;  %v934_v26 = vadd.f32 %v1001_v1, %v933_v25 }
 0x4f2   :  { %960 = vst [vmem:[%s1628_s8 + $0x78] sm:$0xff] %v942_v24 }
 0x4f3   :  { %958 = vst [vmem:[%s1628_s8 + $0x68] sm:$0xff] %v934_v26 }
 0x4f4   :  { %965 = vsyncpa [#allocation3], 1 }
 0x4f5   :  { %966 = vsyncpa [#allocation5], 1 }

</bundles_post_ra>
